<compile_context>
chip_gen: v5e
topology: v5e:2x2
jax: 0.10.0
libtpu: 0.0.40
codegen_flags: <defaults>
</compile_context>

<pallas_src>
import jax
import jax.numpy as jnp
from jax.experimental import pallas as pl
from jax.experimental.pallas import tpu as pltpu


def _round_up(x, m):
    return ((x + m - 1) // m) * m


def _vmem_capacity_bytes():
    """Per-core VMEM capacity; conservative (v7x, 64 MiB) fallback."""
    try:
        return int(pltpu.get_tpu_info().vmem_capacity_bytes)
    except Exception:
        return 64 * 1024 * 1024


# ---------------------------------------------------------------------------
# Kernels
# ---------------------------------------------------------------------------
def _make_pa_kernel_3d(C):
    """Sublane-dense tiny-C path.

    x_ref / o_ref : (Nb, C, S, 128) VMEM tiles (dense in sublanes and lanes).
    w_ref (C, C) and b_ref (C,) live in SMEM; the channel contraction is an
    unrolled scalar*vector FMA (C*C statements) -- ample VPU slack for a
    memory-bound kernel.
    """

    def kernel(x_ref, w_ref, b_ref, o_ref):
        x = x_ref[...]
        xf = x.astype(jnp.float32)
        for o in range(C):
            acc = b_ref[o]                                   # SMEM scalar
            for i in range(C):
                acc = acc + w_ref[o, i] * xf[:, i, :, :]
            attn = jax.nn.sigmoid(acc)
            if o_ref.dtype == jnp.float32:
                o_ref[:, o, :, :] = xf[:, o, :, :] * attn
            else:                                            # gate in input dtype
                o_ref[:, o, :, :] = x[:, o, :, :] * attn.astype(o_ref.dtype)

    return kernel


def _make_pa_kernel_2d(C, Nb, use_mxu):
    """Lane-dense path.

    x_ref / o_ref : (Nb, C, TL) tiles.  w_ref (C, C) and b_ref (C, 1) are
    VMEM-resident (constant index_map).  For C > 32 the channel mix uses the
    MXU; otherwise an unrolled broadcast-FMA on the VPU.
    """

    def kernel(x_ref, w_ref, b_ref, o_ref):
        w = w_ref[...]
        b = b_ref[...]                                       # float32 (C, 1)
        if not use_mxu:
            wf = w.astype(jnp.float32)
            b_init = jnp.broadcast_to(b, (C, x_ref.shape[2]))  # hoisted once
        for n in range(Nb):                                  # Nb <= 8, unrolled
            x = x_ref[n]
            if use_mxu:
                # Mem-bound kernel: MXU has slack; default precision matched
                # the f32 reference to ~1e-4 in testing.
                y = jnp.dot(w, x, preferred_element_type=jnp.float32) + b
            else:
                xf = x.astype(jnp.float32)
                y = b_init
                for i in range(C):
                    y = y + wf[:, i:i + 1] * xf[i:i + 1, :]
            attn = jax.nn.sigmoid(y)
            if o_ref.dtype == jnp.float32:
                o_ref[n] = x.astype(jnp.float32) * attn
            else:                                            # gate in input dtype
                o_ref[n] = x * attn.astype(o_ref.dtype)

    return kernel


# ---------------------------------------------------------------------------
# Wrapper / tiling heuristics
# ---------------------------------------------------------------------------
def pa_forward(x_nchw, weight, bias, *, target_tile_bytes=4 * 1024 * 1024):
    """Pixel attention: out = x * sigmoid(conv1x1(x)).

    x_nchw : (N, C, H, W)
    weight : (C, C, 1, 1)   PyTorch Conv2d weight (out_c, in_c, 1, 1)
    bias   : (C,)           PyTorch Conv2d bias
    """
    N, C, H, W = x_nchw.shape
    L = H * W
    dtype = x_nchw.dtype
    itemsize = jnp.dtype(dtype).itemsize
    sublane_pack = 32 // itemsize          # sublane tile rows: f32 -> 8, bf16 -> 16

    capacity = _vmem_capacity_bytes()
    tile_budget = capacity // 2            # for the 4 live x/out tile buffers
    total_bytes = N * C * L * itemsize

    # Sublane-misaligned small C wastes up to half of every vreg / VMEM tile in
    # the (C, TL) layout; use the dense (N, C, L/128, 128) view instead.
    use_3d = (L % 128 == 0) and (C % sublane_pack != 0) and (C <= 16)

    if use_3d:
        L128 = L // 128
        x_view = x_nchw.reshape(N, C, L128, 128)             # free view of NCHW
        w_arg = weight.reshape(C, C).astype(jnp.float32)     # SMEM scalars
        b_arg = bias.reshape(C).astype(jnp.float32)

        # Spatial tile: S sublane-rows of 128 lanes (S % 8 == 0 or S == L128).
        row_bytes = C * 128 * itemsize
        s_target = max(1, target_tile_bytes // row_bytes)
        if s_target >= L128 or L128 <= 8:
            S = L128
        else:
            S = _round_up(s_target, 8)
            if S >= L128:
                S = L128

        # Fold batch into the tile when one image is below the byte target.
        Nb = 1
        img_bytes = C * L * itemsize
        if S == L128 and N > 1 and img_bytes < target_tile_bytes:
            Nb = min(N, max(1, target_tile_bytes // img_bytes))

        def tile_bytes(nb, s):                               # includes sublane pad
            return nb * C * _round_up(s, 8) * 128 * itemsize

        while 4 * tile_bytes(Nb, S) > tile_budget:           # VMEM budget clamp
            if Nb > 1:
                Nb = max(1, Nb // 2)
            elif S > 8:
                S = max(8, ((S // 2) // 8) * 8)
            else:
                break

        # Keep >= 2 parallel grid blocks for v7x's two TensorCores when the
        # tensor is big enough to matter.
        if total_bytes >= (1 << 20) and pl.cdiv(N, Nb) * pl.cdiv(L128, S) < 2:
            if N >= 2:
                Nb = (N + 1) // 2
            elif L128 > 8:
                S = _round_up(pl.cdiv(L128, 2), 8)

        grid = (pl.cdiv(N, Nb), pl.cdiv(L128, S))
        block = (Nb, C, S, 128)
        kernel = _make_pa_kernel_3d(C)
        in_specs = [
            pl.BlockSpec(block, lambda n, s: (n, 0, s, 0)),
            pl.BlockSpec(memory_space=pltpu.MemorySpace.SMEM),   # weight (C, C)
            pl.BlockSpec(memory_space=pltpu.MemorySpace.SMEM),   # bias (C,)
        ]
        out_specs = pl.BlockSpec(block, lambda n, s: (n, 0, s, 0))
        out_shape = jax.ShapeDtypeStruct((N, C, L128, 128), dtype)
        vmem_needed = 4 * tile_bytes(Nb, S)                  # w/b live in SMEM

    else:
        x_view = x_nchw.reshape(N, C, L)                     # free view of NCHW
        w_arg = weight.reshape(C, C).astype(dtype)           # matmul operand dtype
        b_arg = bias.reshape(C, 1).astype(jnp.float32)
        C_pad = _round_up(C, sublane_pack)

        # Lane tile: multiple of 128 lanes, or the full spatial extent.
        tl_target = max(128, target_tile_bytes // max(1, C * itemsize))
        if tl_target >= L or L <= 128:
            TL = L
        else:
            TL = max(128, (min(tl_target, L) // 128) * 128)

        Nb = 1
        img_bytes = C * L * itemsize
        if TL == L and N > 1 and img_bytes < target_tile_bytes:
            Nb = min(N, max(1, target_tile_bytes // img_bytes), 8)  # bounded unroll

        def tile_bytes(nb, tl):                              # includes sublane pad
            return nb * C_pad * tl * itemsize

        while 4 * tile_bytes(Nb, TL) > tile_budget:          # VMEM budget clamp
            if Nb > 1:
                Nb = max(1, Nb // 2)
            elif TL > 128:
                TL = max(128, ((TL // 2) // 128) * 128)
            else:
                break

        if total_bytes >= (1 << 20) and pl.cdiv(N, Nb) * pl.cdiv(L, TL) < 2:
            if N >= 2:
                Nb = (N + 1) // 2
            elif L > 128:
                TL = max(128, _round_up(pl.cdiv(L, 2), 128))

        use_mxu = C > 32       # small C stays on the VPU (v6e MXU is bf16-native)
        grid = (pl.cdiv(N, Nb), pl.cdiv(L, TL))
        block = (Nb, C, TL)
        kernel = _make_pa_kernel_2d(C, Nb, use_mxu)
        in_specs = [
            pl.BlockSpec(block, lambda n, l: (n, 0, l)),
            # Constant index_map -> weight/bias stay resident after the first
            # fetch; their double-buffer cost is negligible, so no
            # pipeline_mode override is needed.
            pl.BlockSpec((C, C), lambda n, l: (0, 0)),
            pl.BlockSpec((C, 1), lambda n, l: (0, 0)),
        ]
        out_specs = pl.BlockSpec(block, lambda n, l: (n, 0, l))
        out_shape = jax.ShapeDtypeStruct((N, C, L), dtype)
        vmem_needed = (4 * tile_bytes(Nb, TL)
                       + 2 * C_pad * _round_up(C, 128) * itemsize   # weight bufs
                       + 2 * _round_up(C, 8) * 128 * 4)             # bias bufs

    # Advisory scheduling hint for XLA (mem-bound op).
    cost = pl.CostEstimate(
        flops=2 * N * L * C * C + 2 * N * L * C,
        transcendentals=N * L * C,
        bytes_accessed=2 * total_bytes + (C * C + C) * 4,
    )

    # Generation-aware VMEM limit: >= what we use, <= physical capacity minus
    # headroom (<= 56 MiB on v7x, <= 100 MiB on v5e/v6e).
    vmem_limit = max(vmem_needed + (4 << 20), 32 << 20)
    vmem_limit = min(vmem_limit, capacity - (8 << 20), 100 << 20)
    vmem_limit = int(max(vmem_limit, vmem_needed + (1 << 20)))

    out = pl.pallas_call(
        kernel,
        out_shape=out_shape,
        grid_spec=pltpu.PrefetchScalarGridSpec(
            num_scalar_prefetch=0,
            grid=grid,
            in_specs=in_specs,
            out_specs=out_specs,
        ),
        compiler_params=pltpu.CompilerParams(
            dimension_semantics=("parallel", "parallel"),
            vmem_limit_bytes=vmem_limit,
        ),
        cost_estimate=cost,
    )(x_view, w_arg, b_arg)

    return out.reshape(N, C, H, W)


def _reference_pa(x_nchw, weight, bias):
    # Plain-JAX reference mirroring PyTorch semantics (1x1 conv + sigmoid gate).
    w = weight.reshape(weight.shape[0], weight.shape[1])     # (out, in)
    y = jnp.einsum("oi,nihw->nohw", w, x_nchw) + bias[None, :, None, None]
    return x_nchw * jax.nn.sigmoid(y)


if __name__ == "__main__":
    key = jax.random.PRNGKey(0)
    kx, kw, kb = jax.random.split(key, 3)

    # --- small-C sublane-dense (VPU) path ----------------------------------
    N, C, H, W = 2, 4, 16, 16
    x = jax.random.normal(kx, (N, C, H, W), dtype=jnp.float32)
    bound = 1.0 / (C ** 0.5)
    weight = jax.random.uniform(kw, (C, C, 1, 1), minval=-bound, maxval=bound,
                                dtype=jnp.float32)
    bias = jax.random.uniform(kb, (C,), minval=-bound, maxval=bound,
                              dtype=jnp.float32)
    out = jax.block_until_ready(pa_forward(x, weight, bias))
    ref = _reference_pa(x, weight, bias)
    assert out.shape == (N, C, H, W)
    assert jnp.allclose(out, ref, atol=1e-5, rtol=1e-5), "mismatch (small-C path)"

    # --- sublane-aligned C > 32 -> lane-dense MXU path + batch folding ------
    C2, H2, W2 = 40, 32, 36
    x2 = jax.random.normal(kx, (N, C2, H2, W2), dtype=jnp.float32)
    w2 = jax.random.uniform(kw, (C2, C2, 1, 1), minval=-0.1, maxval=0.1,
                            dtype=jnp.float32)
    b2 = jax.random.uniform(kb, (C2,), minval=-0.1, maxval=0.1,
                            dtype=jnp.float32)
    out2 = jax.block_until_ready(pa_forward(x2, w2, b2))
    ref2 = _reference_pa(x2, w2, b2)
    assert jnp.allclose(out2, ref2, atol=1e-4, rtol=1e-4), "mismatch (MXU path)"

    # --- non-128-divisible spatial extent: masked last block, no jnp.pad ----
    H3, W3 = 20, 20
    x3 = jax.random.normal(kx, (N, C, H3, W3), dtype=jnp.float32)
    out3 = jax.block_until_ready(
        pa_forward(x3, weight, bias, target_tile_bytes=1024))
    ref3 = _reference_pa(x3, weight, bias)
    assert jnp.allclose(out3, ref3, atol=1e-5, rtol=1e-5), "mismatch (masked tail)"

    print("KERNEL_OK")
</pallas_src>

<mosaic_0001>
module attributes {stable_mosaic.version = 11 : i64} {
  func.func @kernel(%arg0: i32, %arg1: i32, %arg2: memref<2x4x2x128xf32, #tpu.memory_space<vmem>>, %arg3: memref<4x4xf32, #tpu.memory_space<smem>>, %arg4: memref<4xf32, #tpu.memory_space<smem>>, %arg5: memref<2x4x2x128xf32, #tpu.memory_space<vmem>>) attributes {dimension_semantics = [#tpu.dimension_semantics<parallel>, #tpu.dimension_semantics<parallel>], iteration_bounds = array<i64: 1, 1>, scalar_prefetch = 0 : i64, scratch_operands = 0 : i64, tpu.core_type = #tpu.core_type<tc>, window_params = [{transform_indices = @transform_0, window_bounds = array<i64: 2, 4, 2, 128>}, {transform_indices = @transform_1, window_bounds = array<i64: 4, 4>}, {transform_indices = @transform_2, window_bounds = array<i64: 4>}, {transform_indices = @transform_3, window_bounds = array<i64: 2, 4, 2, 128>}]} {
    %c0 = arith.constant 0 : index
    %c0_0 = arith.constant 0 : index
    %c0_1 = arith.constant 0 : index
    %c0_2 = arith.constant 0 : index
    %0 = vector.load %arg2[%c0, %c0_0, %c0_1, %c0_2] : memref<2x4x2x128xf32, #tpu.memory_space<vmem>>, vector<2x4x2x128xf32>
    %c0_3 = arith.constant 0 : index
    %1 = memref.load %arg4[%c0_3] : memref<4xf32, #tpu.memory_space<smem>>
    %c0_4 = arith.constant 0 : index
    %c0_5 = arith.constant 0 : index
    %2 = memref.load %arg3[%c0_4, %c0_5] : memref<4x4xf32, #tpu.memory_space<smem>>
    %3 = vector.extract_strided_slice %0 {offsets = [0, 0, 0, 0], sizes = [2, 1, 2, 128], strides = [1, 1, 1, 1]} : vector<2x4x2x128xf32> to vector<2x1x2x128xf32>
    %4 = vector.shape_cast %3 : vector<2x1x2x128xf32> to vector<2x2x128xf32>
    %5 = vector.broadcast %2 : f32 to vector<2x2x128xf32>
    %6 = arith.mulf %5, %4 : vector<2x2x128xf32>
    %7 = vector.broadcast %1 : f32 to vector<2x2x128xf32>
    %8 = arith.addf %7, %6 : vector<2x2x128xf32>
    %c0_6 = arith.constant 0 : index
    %c1 = arith.constant 1 : index
    %9 = memref.load %arg3[%c0_6, %c1] : memref<4x4xf32, #tpu.memory_space<smem>>
    %10 = vector.extract_strided_slice %0 {offsets = [0, 1, 0, 0], sizes = [2, 1, 2, 128], strides = [1, 1, 1, 1]} : vector<2x4x2x128xf32> to vector<2x1x2x128xf32>
    %11 = vector.shape_cast %10 : vector<2x1x2x128xf32> to vector<2x2x128xf32>
    %12 = vector.broadcast %9 : f32 to vector<2x2x128xf32>
    %13 = arith.mulf %12, %11 : vector<2x2x128xf32>
    %14 = arith.addf %8, %13 : vector<2x2x128xf32>
    %c0_7 = arith.constant 0 : index
    %c2 = arith.constant 2 : index
    %15 = memref.load %arg3[%c0_7, %c2] : memref<4x4xf32, #tpu.memory_space<smem>>
    %16 = vector.extract_strided_slice %0 {offsets = [0, 2, 0, 0], sizes = [2, 1, 2, 128], strides = [1, 1, 1, 1]} : vector<2x4x2x128xf32> to vector<2x1x2x128xf32>
    %17 = vector.shape_cast %16 : vector<2x1x2x128xf32> to vector<2x2x128xf32>
    %18 = vector.broadcast %15 : f32 to vector<2x2x128xf32>
    %19 = arith.mulf %18, %17 : vector<2x2x128xf32>
    %20 = arith.addf %14, %19 : vector<2x2x128xf32>
    %c0_8 = arith.constant 0 : index
    %c3 = arith.constant 3 : index
    %21 = memref.load %arg3[%c0_8, %c3] : memref<4x4xf32, #tpu.memory_space<smem>>
    %22 = vector.extract_strided_slice %0 {offsets = [0, 3, 0, 0], sizes = [2, 1, 2, 128], strides = [1, 1, 1, 1]} : vector<2x4x2x128xf32> to vector<2x1x2x128xf32>
    %23 = vector.shape_cast %22 : vector<2x1x2x128xf32> to vector<2x2x128xf32>
    %24 = vector.broadcast %21 : f32 to vector<2x2x128xf32>
    %25 = arith.mulf %24, %23 : vector<2x2x128xf32>
    %26 = arith.addf %20, %25 : vector<2x2x128xf32>
    %27 = arith.negf %26 : vector<2x2x128xf32>
    %28 = math.exp %27 : vector<2x2x128xf32>
    %cst = arith.constant 1.000000e+00 : f32
    %29 = vector.broadcast %cst : f32 to vector<2x2x128xf32>
    %30 = arith.addf %29, %28 : vector<2x2x128xf32>
    %31 = arith.divf %29, %30 : vector<2x2x128xf32>
    %32 = vector.extract_strided_slice %0 {offsets = [0, 0, 0, 0], sizes = [2, 1, 2, 128], strides = [1, 1, 1, 1]} : vector<2x4x2x128xf32> to vector<2x1x2x128xf32>
    %33 = vector.shape_cast %32 : vector<2x1x2x128xf32> to vector<2x2x128xf32>
    %34 = arith.mulf %33, %31 : vector<2x2x128xf32>
    %c0_9 = arith.constant 0 : index
    %c0_10 = arith.constant 0 : index
    %c0_11 = arith.constant 0 : index
    %c0_12 = arith.constant 0 : index
    %35 = vector.load %arg5[%c0_9, %c0_10, %c0_11, %c0_12] : memref<2x4x2x128xf32, #tpu.memory_space<vmem>>, vector<2x1x2x128xf32>
    %36 = vector.shape_cast %35 : vector<2x1x2x128xf32> to vector<2x2x128xf32>
    %37 = vector.shape_cast %34 : vector<2x2x128xf32> to vector<2x1x2x128xf32>
    tpu.vector_store %arg5[%c0_9, %c0_10, %c0_11, %c0_12], %37 {strides = array<i32>} : memref<2x4x2x128xf32, #tpu.memory_space<vmem>>, vector<2x1x2x128xf32>,
    %c1_13 = arith.constant 1 : index
    %38 = memref.load %arg4[%c1_13] : memref<4xf32, #tpu.memory_space<smem>>
    %c1_14 = arith.constant 1 : index
    %c0_15 = arith.constant 0 : index
    %39 = memref.load %arg3[%c1_14, %c0_15] : memref<4x4xf32, #tpu.memory_space<smem>>
    %40 = vector.extract_strided_slice %0 {offsets = [0, 0, 0, 0], sizes = [2, 1, 2, 128], strides = [1, 1, 1, 1]} : vector<2x4x2x128xf32> to vector<2x1x2x128xf32>
    %41 = vector.shape_cast %40 : vector<2x1x2x128xf32> to vector<2x2x128xf32>
    %42 = vector.broadcast %39 : f32 to vector<2x2x128xf32>
    %43 = arith.mulf %42, %41 : vector<2x2x128xf32>
    %44 = vector.broadcast %38 : f32 to vector<2x2x128xf32>
    %45 = arith.addf %44, %43 : vector<2x2x128xf32>
    %c1_16 = arith.constant 1 : index
    %c1_17 = arith.constant 1 : index
    %46 = memref.load %arg3[%c1_16, %c1_17] : memref<4x4xf32, #tpu.memory_space<smem>>
    %47 = vector.extract_strided_slice %0 {offsets = [0, 1, 0, 0], sizes = [2, 1, 2, 128], strides = [1, 1, 1, 1]} : vector<2x4x2x128xf32> to vector<2x1x2x128xf32>
    %48 = vector.shape_cast %47 : vector<2x1x2x128xf32> to vector<2x2x128xf32>
    %49 = vector.broadcast %46 : f32 to vector<2x2x128xf32>
    %50 = arith.mulf %49, %48 : vector<2x2x128xf32>
    %51 = arith.addf %45, %50 : vector<2x2x128xf32>
    %c1_18 = arith.constant 1 : index
    %c2_19 = arith.constant 2 : index
    %52 = memref.load %arg3[%c1_18, %c2_19] : memref<4x4xf32, #tpu.memory_space<smem>>
    %53 = vector.extract_strided_slice %0 {offsets = [0, 2, 0, 0], sizes = [2, 1, 2, 128], strides = [1, 1, 1, 1]} : vector<2x4x2x128xf32> to vector<2x1x2x128xf32>
    %54 = vector.shape_cast %53 : vector<2x1x2x128xf32> to vector<2x2x128xf32>
    %55 = vector.broadcast %52 : f32 to vector<2x2x128xf32>
    %56 = arith.mulf %55, %54 : vector<2x2x128xf32>
    %57 = arith.addf %51, %56 : vector<2x2x128xf32>
    %c1_20 = arith.constant 1 : index
    %c3_21 = arith.constant 3 : index
    %58 = memref.load %arg3[%c1_20, %c3_21] : memref<4x4xf32, #tpu.memory_space<smem>>
    %59 = vector.extract_strided_slice %0 {offsets = [0, 3, 0, 0], sizes = [2, 1, 2, 128], strides = [1, 1, 1, 1]} : vector<2x4x2x128xf32> to vector<2x1x2x128xf32>
    %60 = vector.shape_cast %59 : vector<2x1x2x128xf32> to vector<2x2x128xf32>
    %61 = vector.broadcast %58 : f32 to vector<2x2x128xf32>
    %62 = arith.mulf %61, %60 : vector<2x2x128xf32>
    %63 = arith.addf %57, %62 : vector<2x2x128xf32>
    %64 = arith.negf %63 : vector<2x2x128xf32>
    %65 = math.exp %64 : vector<2x2x128xf32>
    %cst_22 = arith.constant 1.000000e+00 : f32
    %66 = vector.broadcast %cst_22 : f32 to vector<2x2x128xf32>
    %67 = arith.addf %66, %65 : vector<2x2x128xf32>
    %68 = arith.divf %66, %67 : vector<2x2x128xf32>
    %69 = vector.extract_strided_slice %0 {offsets = [0, 1, 0, 0], sizes = [2, 1, 2, 128], strides = [1, 1, 1, 1]} : vector<2x4x2x128xf32> to vector<2x1x2x128xf32>
    %70 = vector.shape_cast %69 : vector<2x1x2x128xf32> to vector<2x2x128xf32>
    %71 = arith.mulf %70, %68 : vector<2x2x128xf32>
    %c0_23 = arith.constant 0 : index
    %c1_24 = arith.constant 1 : index
    %c0_25 = arith.constant 0 : index
    %c0_26 = arith.constant 0 : index
    %72 = vector.load %arg5[%c0_23, %c1_24, %c0_25, %c0_26] : memref<2x4x2x128xf32, #tpu.memory_space<vmem>>, vector<2x1x2x128xf32>
    %73 = vector.shape_cast %72 : vector<2x1x2x128xf32> to vector<2x2x128xf32>
    %74 = vector.shape_cast %71 : vector<2x2x128xf32> to vector<2x1x2x128xf32>
    tpu.vector_store %arg5[%c0_23, %c1_24, %c0_25, %c0_26], %74 {strides = array<i32>} : memref<2x4x2x128xf32, #tpu.memory_space<vmem>>, vector<2x1x2x128xf32>,
    %c2_27 = arith.constant 2 : index
    %75 = memref.load %arg4[%c2_27] : memref<4xf32, #tpu.memory_space<smem>>
    %c2_28 = arith.constant 2 : index
    %c0_29 = arith.constant 0 : index
    %76 = memref.load %arg3[%c2_28, %c0_29] : memref<4x4xf32, #tpu.memory_space<smem>>
    %77 = vector.extract_strided_slice %0 {offsets = [0, 0, 0, 0], sizes = [2, 1, 2, 128], strides = [1, 1, 1, 1]} : vector<2x4x2x128xf32> to vector<2x1x2x128xf32>
    %78 = vector.shape_cast %77 : vector<2x1x2x128xf32> to vector<2x2x128xf32>
    %79 = vector.broadcast %76 : f32 to vector<2x2x128xf32>
    %80 = arith.mulf %79, %78 : vector<2x2x128xf32>
    %81 = vector.broadcast %75 : f32 to vector<2x2x128xf32>
    %82 = arith.addf %81, %80 : vector<2x2x128xf32>
    %c2_30 = arith.constant 2 : index
    %c1_31 = arith.constant 1 : index
    %83 = memref.load %arg3[%c2_30, %c1_31] : memref<4x4xf32, #tpu.memory_space<smem>>
    %84 = vector.extract_strided_slice %0 {offsets = [0, 1, 0, 0], sizes = [2, 1, 2, 128], strides = [1, 1, 1, 1]} : vector<2x4x2x128xf32> to vector<2x1x2x128xf32>
    %85 = vector.shape_cast %84 : vector<2x1x2x128xf32> to vector<2x2x128xf32>
    %86 = vector.broadcast %83 : f32 to vector<2x2x128xf32>
    %87 = arith.mulf %86, %85 : vector<2x2x128xf32>
    %88 = arith.addf %82, %87 : vector<2x2x128xf32>
    %c2_32 = arith.constant 2 : index
    %c2_33 = arith.constant 2 : index
    %89 = memref.load %arg3[%c2_32, %c2_33] : memref<4x4xf32, #tpu.memory_space<smem>>
    %90 = vector.extract_strided_slice %0 {offsets = [0, 2, 0, 0], sizes = [2, 1, 2, 128], strides = [1, 1, 1, 1]} : vector<2x4x2x128xf32> to vector<2x1x2x128xf32>
    %91 = vector.shape_cast %90 : vector<2x1x2x128xf32> to vector<2x2x128xf32>
    %92 = vector.broadcast %89 : f32 to vector<2x2x128xf32>
    %93 = arith.mulf %92, %91 : vector<2x2x128xf32>
    %94 = arith.addf %88, %93 : vector<2x2x128xf32>
    %c2_34 = arith.constant 2 : index
    %c3_35 = arith.constant 3 : index
    %95 = memref.load %arg3[%c2_34, %c3_35] : memref<4x4xf32, #tpu.memory_space<smem>>
    %96 = vector.extract_strided_slice %0 {offsets = [0, 3, 0, 0], sizes = [2, 1, 2, 128], strides = [1, 1, 1, 1]} : vector<2x4x2x128xf32> to vector<2x1x2x128xf32>
    %97 = vector.shape_cast %96 : vector<2x1x2x128xf32> to vector<2x2x128xf32>
    %98 = vector.broadcast %95 : f32 to vector<2x2x128xf32>
    %99 = arith.mulf %98, %97 : vector<2x2x128xf32>
    %100 = arith.addf %94, %99 : vector<2x2x128xf32>
    %101 = arith.negf %100 : vector<2x2x128xf32>
    %102 = math.exp %101 : vector<2x2x128xf32>
    %cst_36 = arith.constant 1.000000e+00 : f32
    %103 = vector.broadcast %cst_36 : f32 to vector<2x2x128xf32>
    %104 = arith.addf %103, %102 : vector<2x2x128xf32>
    %105 = arith.divf %103, %104 : vector<2x2x128xf32>
    %106 = vector.extract_strided_slice %0 {offsets = [0, 2, 0, 0], sizes = [2, 1, 2, 128], strides = [1, 1, 1, 1]} : vector<2x4x2x128xf32> to vector<2x1x2x128xf32>
    %107 = vector.shape_cast %106 : vector<2x1x2x128xf32> to vector<2x2x128xf32>
    %108 = arith.mulf %107, %105 : vector<2x2x128xf32>
    %c0_37 = arith.constant 0 : index
    %c2_38 = arith.constant 2 : index
    %c0_39 = arith.constant 0 : index
    %c0_40 = arith.constant 0 : index
    %109 = vector.load %arg5[%c0_37, %c2_38, %c0_39, %c0_40] : memref<2x4x2x128xf32, #tpu.memory_space<vmem>>, vector<2x1x2x128xf32>
    %110 = vector.shape_cast %109 : vector<2x1x2x128xf32> to vector<2x2x128xf32>
    %111 = vector.shape_cast %108 : vector<2x2x128xf32> to vector<2x1x2x128xf32>
    tpu.vector_store %arg5[%c0_37, %c2_38, %c0_39, %c0_40], %111 {strides = array<i32>} : memref<2x4x2x128xf32, #tpu.memory_space<vmem>>, vector<2x1x2x128xf32>,
    %c3_41 = arith.constant 3 : index
    %112 = memref.load %arg4[%c3_41] : memref<4xf32, #tpu.memory_space<smem>>
    %c3_42 = arith.constant 3 : index
    %c0_43 = arith.constant 0 : index
    %113 = memref.load %arg3[%c3_42, %c0_43] : memref<4x4xf32, #tpu.memory_space<smem>>
    %114 = vector.extract_strided_slice %0 {offsets = [0, 0, 0, 0], sizes = [2, 1, 2, 128], strides = [1, 1, 1, 1]} : vector<2x4x2x128xf32> to vector<2x1x2x128xf32>
    %115 = vector.shape_cast %114 : vector<2x1x2x128xf32> to vector<2x2x128xf32>
    %116 = vector.broadcast %113 : f32 to vector<2x2x128xf32>
    %117 = arith.mulf %116, %115 : vector<2x2x128xf32>
    %118 = vector.broadcast %112 : f32 to vector<2x2x128xf32>
    %119 = arith.addf %118, %117 : vector<2x2x128xf32>
    %c3_44 = arith.constant 3 : index
    %c1_45 = arith.constant 1 : index
    %120 = memref.load %arg3[%c3_44, %c1_45] : memref<4x4xf32, #tpu.memory_space<smem>>
    %121 = vector.extract_strided_slice %0 {offsets = [0, 1, 0, 0], sizes = [2, 1, 2, 128], strides = [1, 1, 1, 1]} : vector<2x4x2x128xf32> to vector<2x1x2x128xf32>
    %122 = vector.shape_cast %121 : vector<2x1x2x128xf32> to vector<2x2x128xf32>
    %123 = vector.broadcast %120 : f32 to vector<2x2x128xf32>
    %124 = arith.mulf %123, %122 : vector<2x2x128xf32>
    %125 = arith.addf %119, %124 : vector<2x2x128xf32>
    %c3_46 = arith.constant 3 : index
    %c2_47 = arith.constant 2 : index
    %126 = memref.load %arg3[%c3_46, %c2_47] : memref<4x4xf32, #tpu.memory_space<smem>>
    %127 = vector.extract_strided_slice %0 {offsets = [0, 2, 0, 0], sizes = [2, 1, 2, 128], strides = [1, 1, 1, 1]} : vector<2x4x2x128xf32> to vector<2x1x2x128xf32>
    %128 = vector.shape_cast %127 : vector<2x1x2x128xf32> to vector<2x2x128xf32>
    %129 = vector.broadcast %126 : f32 to vector<2x2x128xf32>
    %130 = arith.mulf %129, %128 : vector<2x2x128xf32>
    %131 = arith.addf %125, %130 : vector<2x2x128xf32>
    %c3_48 = arith.constant 3 : index
    %c3_49 = arith.constant 3 : index
    %132 = memref.load %arg3[%c3_48, %c3_49] : memref<4x4xf32, #tpu.memory_space<smem>>
    %133 = vector.extract_strided_slice %0 {offsets = [0, 3, 0, 0], sizes = [2, 1, 2, 128], strides = [1, 1, 1, 1]} : vector<2x4x2x128xf32> to vector<2x1x2x128xf32>
    %134 = vector.shape_cast %133 : vector<2x1x2x128xf32> to vector<2x2x128xf32>
    %135 = vector.broadcast %132 : f32 to vector<2x2x128xf32>
    %136 = arith.mulf %135, %134 : vector<2x2x128xf32>
    %137 = arith.addf %131, %136 : vector<2x2x128xf32>
    %138 = arith.negf %137 : vector<2x2x128xf32>
    %139 = math.exp %138 : vector<2x2x128xf32>
    %cst_50 = arith.constant 1.000000e+00 : f32
    %140 = vector.broadcast %cst_50 : f32 to vector<2x2x128xf32>
    %141 = arith.addf %140, %139 : vector<2x2x128xf32>
    %142 = arith.divf %140, %141 : vector<2x2x128xf32>
    %143 = vector.extract_strided_slice %0 {offsets = [0, 3, 0, 0], sizes = [2, 1, 2, 128], strides = [1, 1, 1, 1]} : vector<2x4x2x128xf32> to vector<2x1x2x128xf32>
    %144 = vector.shape_cast %143 : vector<2x1x2x128xf32> to vector<2x2x128xf32>
    %145 = arith.mulf %144, %142 : vector<2x2x128xf32>
    %c0_51 = arith.constant 0 : index
    %c3_52 = arith.constant 3 : index
    %c0_53 = arith.constant 0 : index
    %c0_54 = arith.constant 0 : index
    %146 = vector.load %arg5[%c0_51, %c3_52, %c0_53, %c0_54] : memref<2x4x2x128xf32, #tpu.memory_space<vmem>>, vector<2x1x2x128xf32>
    %147 = vector.shape_cast %146 : vector<2x1x2x128xf32> to vector<2x2x128xf32>
    %148 = vector.shape_cast %145 : vector<2x2x128xf32> to vector<2x1x2x128xf32>
    tpu.vector_store %arg5[%c0_51, %c3_52, %c0_53, %c0_54], %148 {strides = array<i32>} : memref<2x4x2x128xf32, #tpu.memory_space<vmem>>, vector<2x1x2x128xf32>,
    return
  }
  func.func @transform_0(%arg0: i32, %arg1: i32) -> (i32, i32, i32, i32) {
    %c0_i32 = arith.constant 0 : i32
    %c0_i32_0 = arith.constant 0 : i32
    %c0_i32_1 = arith.constant 0 : i32
    return %arg0, %c0_i32, %arg1, %c0_i32_0 : i32, i32, i32, i32
  }
  func.func @transform_1(%arg0: i32, %arg1: i32) -> (i32, i32) {
    %c0_i32 = arith.constant 0 : i32
    %c0_i32_0 = arith.constant 0 : i32
    %c0_i32_1 = arith.constant 0 : i32
    return %c0_i32, %c0_i32_0 : i32, i32
  }
  func.func @transform_2(%arg0: i32, %arg1: i32) -> i32 {
    %c0_i32 = arith.constant 0 : i32
    %c0_i32_0 = arith.constant 0 : i32
    return %c0_i32 : i32
  }
  func.func @transform_3(%arg0: i32, %arg1: i32) -> (i32, i32, i32, i32) {
    %c0_i32 = arith.constant 0 : i32
    %c0_i32_0 = arith.constant 0 : i32
    %c0_i32_1 = arith.constant 0 : i32
    return %arg0, %c0_i32, %arg1, %c0_i32_0 : i32, i32, i32, i32
  }
}

</mosaic_0001>

<bundles_post_ra>
// kernel: tpu_custom_call.1
= control target key start
LH: loop header
LB: loop body
LE: loop exit
PB: predicated region body
PF: predicated region fallthrough
CT: control target
= control target key end

     0   :  { %8 = vsyncpa [#allocation3], 0  ;;  %s751_s0 = inlined_call_operand.hbm [shape: f32[2,4,2,128], index: 0, kind: input, shape index: {}]   ;;  %s752_s1 = inlined_call_operand.hbm [shape: f32[4,4], index: 1, kind: input, shape index: {}]   ;;  %s753_s2 = inlined_call_operand.vmem [shape: f32[4], index: 2, kind: input, shape index: {}]   ;;  %s754_s3 = inlined_call_operand.hbm [shape: f32[2,4,2,128], index: 3, kind: output, shape index: {}]  }
   0x1   :  { %9 = vsyncpa [#allocation5], 0 }
   0x2   :  { %10 = vsyncpa [#allocation6], 0 }
   0x3   :  { %11 = vsyncpa [#allocation4], 0  ;;  %s16_s14 = sshll.u32 %s751_s0, 4  ;;  %s504_s15 = smov [#allocation2]   ;;  %s17_s14 = int_to_ptr.hbm [resolvable:$true] %s16_s14 }
   0x4   :  { %s18_s16 = sshll.u32 %s504_s15, 4  ;;  %s30_s19 = sshll.u32 %s752_s1, 4  ;;  %s19_s16 = int_to_ptr.vmem [resolvable:$true] %s18_s16  ;;  %s31_s19 = int_to_ptr.hbm [resolvable:$true] %s30_s19 }
   0x5   :  { %s505_s20 = smov 32   ;;  %s506_s21 = smov 2  }
   0x6   :  { %24 = dma.hbm_to_vmem [thread:$0]  %s17_s14, 256, %s19_s16, [#allocation3], %s505_s20, %s505_s20, %s506_s21  }
   0x7   :  { %s507_s22 = smov [#allocation7]   ;;  %s39_s0 = sshll.u32 %s753_s2, 4  ;;  %s40_s0 = int_to_ptr.vmem [resolvable:$true] %s39_s0 }
   0x8   :  { %33 = dma.hbm_to_smem %s31_s19, 64, %s507_s22, [#allocation5]  }
   0x9   :  { %s508_s25 = smov [#allocation8]  }
   0xa   :  { %42 = dma.vmem_to_smem %s40_s0, 16, %s508_s25, [#allocation6]  }
   0xb   :  { %496 = dma.done.wait [#allocation3], 256  }
   0xc   :  { %497 = vsyncadd [#allocation3], 4294967040 }
   0xd   :  { %498 = dma.done.wait [#allocation5], 64  }
   0xe   :  { %499 = vsyncadd [#allocation5], 4294967232 }
   0xf   :  { %500 = dma.done.wait [#allocation6], 16  }
  0x10   :  { %501 = vsyncadd [#allocation6], 4294967280 }
  0x11   :  { %55 = sfence }
  0x12   :  { %s64_s1 = sld [smem:[#allocation8]]  ;;  %v546_v0 = vld [vmem:[#allocation2] sm:$0x3]  ;;  %v550_v1 = vld [vmem:[#allocation2 + $0x8] sm:$0x3]  ;;  %s509_s17 = smov [#allocation9]  }
  0x13   :  { %s65_s26 = sld [smem:[#allocation7]]  ;;  %v552_v2 = vld [vmem:[#allocation2 + $0x2] sm:$0x3]  ;;  %v556_v3 = vld [vmem:[#allocation2 + $0xa] sm:$0x3]  ;;  %s343_s18 = sshll.u32 %s509_s17, 4  ;;  %s344_s18 = int_to_ptr.vmem [resolvable:$true] %s343_s18 }
  0x14   :  { %s360_s27 = sld [smem:[#allocation7 + $0x1]]  ;;  %v558_v4 = vld [vmem:[#allocation2 + $0x4] sm:$0x3]  ;;  %v562_v7 = vld [vmem:[#allocation2 + $0x6] sm:$0x3]  ;;  %s345_s23 = sshll.u32 %s754_s3, 4  ;;  %s346_s23 = int_to_ptr.hbm [resolvable:$true] %s345_s23 }
  0x15   :  { %s542_s28 = sld [smem:[#allocation7 + $0x2]]  ;;  %v567_v10 = vld [vmem:[#allocation2 + $0xc] sm:$0x3]  ;;  %v574_v14 = vld [vmem:[#allocation2 + $0xe] sm:$0x3] }
  0x16   :  { %s544_s29 = sld [smem:[#allocation7 + $0x3]] }
  0x17   :  { %s548_s2 = sld [smem:[#allocation8 + $0x1]] }
  0x18   :  { %s554_s30 = sld [smem:[#allocation7 + $0x80]]  ;;  %v69_v6 = vstv %s64_s1 }
  0x19   :  { %v66_v5 = vstv %s65_s26  ;;  %s560_s4 = sld [smem:[#allocation7 + $0x81]] }
  0x1a   :  { %v67_v8 = vmul.f32 %v66_v5, %v546_v0  ;;  %v73_v9 = vstv %s360_s27  ;;  %s565_s5 = sld [smem:[#allocation7 + $0x82]]  ;;  %v68_v11 = vmul.f32 %v66_v5, %v550_v1 }
  0x1b   :  { %v74_v12 = vmul.f32 %v73_v9, %v552_v2  ;;  %v79_v13 = vstv %s542_s28  ;;  %s572_s6 = sld [smem:[#allocation8 + $0x2]]  ;;  %v75_v15 = vmul.f32 %v73_v9, %v556_v3 }
  0x1c   :  { %v70_v16 = vadd.f32 %v69_v6, %v67_v8  ;;  %v80_v17 = vmul.f32 %v79_v13, %v558_v4  ;;  %v85_v18 = vstv %s544_s29  ;;  %s579_s7 = sld [smem:[#allocation7 + $0x100]]  ;;  %v71_v19 = vadd.f32 %v69_v6, %v68_v11 }
  0x1d   :  { %v86_v20 = vmul.f32 %v85_v18, %v562_v7  ;;  %v137_v21 = vstv %s548_s2  ;;  %s583_s8 = sld [smem:[#allocation7 + $0x101]]  ;;  %v81_v22 = vmul.f32 %v79_v13, %v567_v10  ;;  %v87_v26 = vmul.f32 %v85_v18, %v574_v14 }
  0x1e   :  { %v76_v23 = vadd.f32 %v74_v12, %v70_v16  ;;  %v134_v24 = vstv %s554_s30  ;;  %s587_s9 = sld [smem:[#allocation7 + $0x102]]  ;;  %v77_v25 = vadd.f32 %v75_v15, %v71_v19 }
  0x1f   :  { %v135_v27 = vmul.f32 %v134_v24, %v546_v0  ;;  %v141_v28 = vstv %s560_s4  ;;  %s592_s10 = sld [smem:[#allocation8 + $0x3]]  ;;  %v136_v29 = vmul.f32 %v134_v24, %v550_v1 }
  0x20   :  { %v82_v30 = vadd.f32 %v80_v17, %v76_v23  ;;  %v142_v31 = vmul.f32 %v141_v28, %v552_v2  ;;  %v147_v32 = vstv %s565_s5  ;;  %s597_s11 = sld [smem:[#allocation7 + $0x180]]  ;;  %v83_v33 = vadd.f32 %v81_v22, %v77_v25 }
  0x21   :  { %v138_v34 = vadd.f32 %v137_v21, %v135_v27  ;;  %v206_v35 = vstv %s572_s6  ;;  %s600_s12 = sld [smem:[#allocation7 + $0x181]]  ;;  %v139_v36 = vadd.f32 %v137_v21, %v136_v29  ;;  %v143_v40 = vmul.f32 %v141_v28, %v556_v3 }
  0x22   :  { %v88_v37 = vadd.f32 %v86_v20, %v82_v30  ;;  %v203_v38 = vstv %s579_s7  ;;  %s603_s13 = sld [smem:[#allocation7 + $0x182]]  ;;  %v89_v39 = vadd.f32 %v87_v26, %v83_v33  ;;  %v148_v41 = vmul.f32 %v147_v32, %v558_v4 }
  0x23   :  { %v204_v42 = vmul.f32 %v203_v38, %v546_v0  ;;  %v210_v43 = vstv %s583_s8  ;;  %s609_s14 = sld [smem:[#allocation7 + $0x83]]  ;;  %v144_v45 = vadd.f32 %v142_v31, %v138_v34  ;;  %v149_v51 = vmul.f32 %v147_v32, %v567_v10 }
  0x24   :  { %v363_v44 = vmul.f32 -1.442695, %v88_v37  ;;  %v211_v46 = vmul.f32 %v210_v43, %v552_v2  ;;  %v364_v47 = vmul.f32 -1.442695, %v89_v39  ;;  %s612_s15 = sld [smem:[#allocation7 + $0x103]]  ;;  %v216_v49 = vstv %s587_s9 }
  0x25   :  { %v207_v48 = vadd.f32 %v206_v35, %v204_v42  ;;  %v275_v50 = vstv %s592_s10  ;;  %v145_v53 = vadd.f32 %v143_v40, %v139_v36  ;;  %v205_v54 = vmul.f32 %v203_v38, %v550_v1  ;;  %s630_s16 = sld [smem:[#allocation7 + $0x183]] }
  0x26   :  { %392 = vpow2.f32 %v363_v44  ;;  %v272_v52 = vstv %s597_s11  ;;  %v217_v58 = vmul.f32 %v216_v49, %v558_v4  ;;  %v150_v60 = vadd.f32 %v148_v41, %v144_v45 }
  0x27   :  { %v273_v55 = vmul.f32 %v272_v52, %v546_v0  ;;  %v279_v56 = vstv %s600_s12  ;;  %394 = vpow2.f32 %v364_v47  ;;  %v213_v57 = vadd.f32 %v211_v46, %v207_v48 }
  0x28   :  { %v208_v59 = vadd.f32 %v206_v35, %v205_v54  ;;  %v280_v62 = vmul.f32 %v279_v56, %v552_v2  ;;  %v212_v63 = vmul.f32 %v210_v43, %v556_v3  ;;  %v285_v5 = vstv %s603_s13 }
  0x29   :  { %v276_v61 = vadd.f32 %v275_v50, %v273_v55  ;;  %v151_v6 = vadd.f32 %v149_v51, %v145_v53  ;;  %v218_v8 = vmul.f32 %v216_v49, %v567_v10  ;;  %v274_v9 = vmul.f32 %v272_v52, %v550_v1 }
  0x2a   :  { %v214_v11 = vadd.f32 %v212_v63, %v208_v59  ;;  %v281_v12 = vmul.f32 %v279_v56, %v556_v3  ;;  %v153_v13 = vstv %s609_s14  ;;  %v222_v15 = vstv %s612_s15 }
  0x2b   :  { %v219_v17 = vadd.f32 %v217_v58, %v213_v57  ;;  %v277_v18 = vadd.f32 %v275_v50, %v274_v9  ;;  %v154_v19 = vmul.f32 %v153_v13, %v562_v7  ;;  %v155_v20 = vmul.f32 %v153_v13, %v574_v14 }
  0x2c   :  { %v393_v16 = vpop.eup %392  ;;  %v282_v23 = vadd.f32 %v280_v62, %v276_v61  ;;  %v286_v24 = vmul.f32 %v285_v5, %v558_v4  ;;  %v287_v25 = vmul.f32 %v285_v5, %v567_v10  ;;  %v223_v29 = vmul.f32 %v222_v15, %v562_v7 }
  0x2d   :  { %v395_v21 = vpop.eup %394  ;;  %v96_v22 = vadd.f32 1.0, %v393_v16  ;;  %v156_v27 = vadd.f32 %v154_v19, %v150_v60  ;;  %v157_v28 = vadd.f32 %v155_v20, %v151_v6  ;;  %v220_v30 = vadd.f32 %v218_v8, %v214_v11 }
  0x2e   :  { %v97_v26 = vadd.f32 1.0, %v395_v21  ;;  %v283_v31 = vadd.f32 %v281_v12, %v277_v18  ;;  %v224_v32 = vmul.f32 %v222_v15, %v574_v14  ;;  %v288_v34 = vadd.f32 %v286_v24, %v282_v23 }
  0x2f   :  { %396 = vrcp.f32 %v96_v22  ;;  %v370_v33 = vmul.f32 -1.442695, %v156_v27  ;;  %v371_v35 = vmul.f32 -1.442695, %v157_v28  ;;  %v225_v36 = vadd.f32 %v223_v29, %v219_v17 }
  0x30   :  { %398 = vrcp.f32 %v97_v26  ;;  %v289_v37 = vadd.f32 %v287_v25, %v283_v31  ;;  %v226_v38 = vadd.f32 %v224_v32, %v220_v30  ;;  %v291_v39 = vstv %s630_s16 }
  0x31   :  { %400 = vpow2.f32 %v370_v33  ;;  %v377_v40 = vmul.f32 -1.442695, %v225_v36  ;;  %v292_v41 = vmul.f32 %v291_v39, %v562_v7  ;;  %v293_v42 = vmul.f32 %v291_v39, %v574_v14 }
  0x32   :  { %402 = vpow2.f32 %v371_v35  ;;  %vm103_vm0 = vweird.f32 %v96_v22  ;;  %v107_v44 = vand.u32 2147483647, %v96_v22  ;;  %v378_v45 = vmul.f32 -1.442695, %v226_v38 }
  0x33   :  { %v109_v48 = vand.u32 2147483648, %v96_v22  ;;  %404 = vpow2.f32 %v377_v40  ;;  %v294_v49 = vadd.f32 %v292_v41, %v288_v34  ;;  %vm118_vm1 = vweird.f32 %v97_v26 }
  0x34   :  { %v122_v51 = vand.u32 2147483647, %v97_v26  ;;  %v295_v52 = vadd.f32 %v293_v42, %v289_v37  ;;  %v124_v54 = vand.u32 2147483648, %v97_v26  ;;  %406 = vpow2.f32 %v378_v45 }
  0x35   :  { %v397_v43 = vpop.eup %396  ;;  %v384_v55 = vmul.f32 -1.442695, %v294_v49  ;;  %v110_v63 = vor.u32 1.1754944e-38, %v109_v48  ;;  %vm108_vm5 = vcmp.eq.f32.partialorder %v107_v44, 8.507059e+37 }
  0x36   :  { %v399_v46 = vpop.eup %398  ;;  %v99_v47 = vmul.f32 %v397_v43, %v96_v22  ;;  %vm104_vm2 = vweird.f32 %v397_v43  ;;  %v385_v58 = vmul.f32 -1.442695, %v295_v52  ;;  %v125_v11 = vor.u32 1.1754944e-38, %v124_v54 }
  0x37   :  { %v114_v50 = vmul.f32 %v399_v46, %v97_v26  ;;  %v401_v56 = vpop.eup %400  ;;  %vm119_vm3 = vweird.f32 %v399_v46  ;;  %408 = vpow2.f32 %v384_v55  ;;  %vm642_vm4 = vmor %vm103_vm0, %vm104_vm2  ;;  %vm123_vm7 = vcmp.eq.f32.partialorder %v122_v51, 8.507059e+37 }
  0x38   :  { %v100_v53 = vsub.f32 1.0, %v99_v47  ;;  %v403_v59 = vpop.eup %402  ;;  %v164_v61 = vadd.f32 1.0, %v401_v56  ;;  %410 = vpow2.f32 %v385_v58  ;;  %vm120_vm6 = vmor %vm118_vm1, %vm119_vm3 }
  0x39   :  { %v115_v57 = vsub.f32 1.0, %v114_v50  ;;  %v165_v6 = vadd.f32 1.0, %v403_v59  ;;  %v405_v8 = vpop.eup %404 }
  0x3a   :  { %v101_v60 = vmul.f32 %v397_v43, %v100_v53  ;;  %412 = vrcp.f32 %v164_v61  ;;  %v407_v15 = vpop.eup %406  ;;  %v650_v18 = vadd.f32 1.0, %v405_v8  ;;  %v175_v24 = vand.u32 2147483647, %v164_v61 }
  0x3b   :  { %v116_v5 = vmul.f32 %v399_v46, %v115_v57  ;;  %414 = vrcp.f32 %v165_v6  ;;  %vm171_vm8 = vweird.f32 %v164_v61  ;;  %v177_v26 = vand.u32 2147483648, %v164_v61 }
  0x3c   :  { %v102_v9 = vadd.f32 %v397_v43, %v101_v60  ;;  %416 = vrcp.f32 %v650_v18  ;;  %v655_v27 = vadd.f32 1.0, %v407_v15  ;;  %vm186_vm9 = vweird.f32 %v165_v6 }
  0x3d   :  { %v117_v12 = vadd.f32 %v399_v46, %v116_v5  ;;  %v409_v19 = vpop.eup %408  ;;  %v192_v31 = vand.u32 2147483648, %v165_v6  ;;  %v246_v33 = vand.u32 2147483648, %v650_v18  ;;  %vm662_vm11 = vcmp.eq.f32.partialorder %v175_v24, 8.507059e+37 }
  0x3e   :  { %v106_v13 = vsel %vm642_vm4, %v397_v43, %v102_v9  ;;  %v411_v22 = vpop.eup %410  ;;  %v657_v28 = vadd.f32 1.0, %v409_v19  ;;  %418 = vrcp.f32 %v655_v27  ;;  %v178_v37 = vor.u32 1.1754944e-38, %v177_v26 }
  0x3f   :  { %v111_v16 = vsel %vm108_vm5, %v110_v63, %v106_v13  ;;  %v121_v17 = vsel %vm120_vm6, %v399_v46, %v117_v12  ;;  %v666_v36 = vadd.f32 1.0, %v411_v22  ;;  %v193_v42 = vor.u32 1.1754944e-38, %v192_v31 }
  0x40   :  { %v128_v20 = vmul.f32 %v111_v16, %v546_v0  ;;  %v126_v21 = vsel %vm123_vm7, %v125_v11, %v121_v17  ;;  %v413_v25 = vpop.eup %412  ;;  %v190_v0 = vand.u32 2147483647, %v165_v6  ;;  %420 = vrcp.f32 %v657_v28 }
  0x41   :  { %v129_v23 = vmul.f32 %v126_v21, %v550_v1  ;;  %v415_v29 = vpop.eup %414  ;;  %v167_v30 = vmul.f32 %v413_v25, %v164_v61  ;;  %v244_v1 = vand.u32 2147483647, %v650_v18  ;;  %vm172_vm10 = vweird.f32 %v413_v25 }
  0x42   :  { %130 = vst [vmem:[#allocation9] sm:$0x3] %v128_v20  ;;  %v182_v32 = vmul.f32 %v415_v29, %v165_v6  ;;  %vm187_vm12 = vweird.f32 %v415_v29  ;;  %v417_v39 = vpop.eup %416  ;;  %vm669_vm13 = vcmp.eq.f32.partialorder %v190_v0, 8.507059e+37  ;;  %vm240_vm14 = vweird.f32 %v650_v18  ;;  %vm675_vm15 = vmor %vm171_vm8, %vm172_vm10 }
  0x43   :  { %131 = vst [vmem:[#allocation9 + $0x8] sm:$0x3] %v129_v23  ;;  %v168_v34 = vsub.f32 1.0, %v167_v30  ;;  %v236_v45 = vmul.f32 %v417_v39, %v650_v18  ;;  %vm680_vm0 = vcmp.eq.f32.partialorder %v244_v1, 8.507059e+37  ;;  %v247_v47 = vor.u32 1.1754944e-38, %v246_v33  ;;  %vm685_vm1 = vmor %vm186_vm9, %vm187_vm12 }
  0x44   :  { %v183_v38 = vsub.f32 1.0, %v182_v32  ;;  %vm255_vm2 = vweird.f32 %v655_v27  ;;  %v259_v50 = vand.u32 2147483647, %v655_v27  ;;  %422 = vrcp.f32 %v666_v36  ;;  %v419_v51 = vpop.eup %418 }
  0x45   :  { %v169_v40 = vmul.f32 %v413_v25, %v168_v34  ;;  %v237_v53 = vsub.f32 1.0, %v236_v45  ;;  %vm241_vm3 = vweird.f32 %v417_v39  ;;  %v261_v54 = vand.u32 2147483648, %v655_v27 }
  0x46   :  { %v184_v44 = vmul.f32 %v415_v29, %v183_v38  ;;  %v251_v56 = vmul.f32 %v419_v51, %v655_v27  ;;  %vm309_vm4 = vweird.f32 %v657_v28  ;;  %v315_v57 = vand.u32 2147483648, %v657_v28  ;;  %v421_v58 = vpop.eup %420  ;;  %vm707_vm6 = vmor %vm240_vm14, %vm241_vm3 }
  0x47   :  { %v170_v48 = vadd.f32 %v413_v25, %v169_v40  ;;  %v238_v61 = vmul.f32 %v417_v39, %v237_v53  ;;  %vm256_vm5 = vweird.f32 %v419_v51  ;;  %v305_v8 = vmul.f32 %v421_v58, %v657_v28 }
  0x48   :  { %v185_v52 = vadd.f32 %v415_v29, %v184_v44  ;;  %v252_v6 = vsub.f32 1.0, %v251_v56  ;;  %vm713_vm7 = vcmp.eq.f32.partialorder %v259_v50, 8.507059e+37  ;;  %v262_v16 = vor.u32 1.1754944e-38, %v261_v54  ;;  %vm723_vm9 = vmor %vm255_vm2, %vm256_vm5 }
  0x49   :  { %v174_v55 = vsel %vm675_vm15, %v413_v25, %v170_v48  ;;  %v239_v11 = vadd.f32 %v417_v39, %v238_v61  ;;  %v306_v17 = vsub.f32 1.0, %v305_v8  ;;  %vm310_vm8 = vweird.f32 %v421_v58 }
  0x4a   :  { %v179_v59 = vsel %vm662_vm11, %v178_v37, %v174_v55  ;;  %v189_v60 = vsel %vm685_vm1, %v415_v29, %v185_v52  ;;  %v423_v13 = vpop.eup %422  ;;  %v253_v15 = vmul.f32 %v419_v51, %v252_v6  ;;  %v316_v19 = vor.u32 1.1754944e-38, %v315_v57  ;;  %vm311_vm11 = vmor %vm309_vm4, %vm310_vm8 }
  0x4b   :  { %v196_v62 = vmul.f32 %v179_v59, %v552_v2  ;;  %v194_v63 = vsel %vm669_vm13, %v193_v42, %v189_v60  ;;  %v313_v2 = vand.u32 2147483647, %v657_v28  ;;  %v243_v18 = vsel %vm707_vm6, %v417_v39, %v239_v11 }
  0x4c   :  { %v197_v9 = vmul.f32 %v194_v63, %v556_v3  ;;  %v320_v20 = vmul.f32 %v423_v13, %v666_v36  ;;  %vm324_vm10 = vweird.f32 %v666_v36  ;;  %v248_v21 = vsel %vm680_vm0, %v247_v47, %v243_v18 }
  0x4d   :  { %199 = vst [vmem:[#allocation9 + $0x2] sm:$0x3] %v196_v62  ;;  %v254_v22 = vadd.f32 %v419_v51, %v253_v15  ;;  %v307_v23 = vmul.f32 %v421_v58, %v306_v17  ;;  %v330_v24 = vand.u32 2147483648, %v666_v36  ;;  %v265_v25 = vmul.f32 %v248_v21, %v558_v4 }
  0x4e   :  { %200 = vst [vmem:[#allocation9 + $0xa] sm:$0x3] %v197_v9  ;;  %v321_v26 = vsub.f32 1.0, %v320_v20  ;;  %vm325_vm12 = vweird.f32 %v423_v13  ;;  %v328_v27 = vand.u32 2147483647, %v666_v36  ;;  %vm314_vm13 = vcmp.eq.f32.partialorder %v313_v2, 8.507059e+37 }
  0x4f   :  { %v258_v29 = vsel %vm723_vm9, %v419_v51, %v254_v22  ;;  %v308_v30 = vadd.f32 %v421_v58, %v307_v23  ;;  %268 = vst [vmem:[#allocation9 + $0x4] sm:$0x3] %v265_v25  ;;  %vm326_vm14 = vmor %vm324_vm10, %vm325_vm12  ;;  %v331_v28 = vor.u32 1.1754944e-38, %v330_v24 }
  0x50   :  { %v263_v0 = vsel %vm713_vm7, %v262_v16, %v258_v29  ;;  %v322_v31 = vmul.f32 %v423_v13, %v321_v26  ;;  %vm329_vm15 = vcmp.eq.f32.partialorder %v328_v27, 8.507059e+37 }
  0x51   :  { %v266_v32 = vmul.f32 %v263_v0, %v567_v10  ;;  %v312_v4 = vsel %vm311_vm11, %v421_v58, %v308_v30 }
  0x52   :  { %v317_v1 = vsel %vm314_vm13, %v316_v19, %v312_v4  ;;  %v323_v33 = vadd.f32 %v423_v13, %v322_v31 }
  0x53   :  { %269 = vst [vmem:[#allocation9 + $0xc] sm:$0x3] %v266_v32  ;;  %v334_v34 = vmul.f32 %v317_v1, %v562_v7 }
  0x54   :  { %v327_v35 = vsel %vm326_vm14, %v423_v13, %v323_v33 }
  0x55   :  { %337 = vst [vmem:[#allocation9 + $0x6] sm:$0x3] %v334_v34  ;;  %v332_v10 = vsel %vm329_vm15, %v331_v28, %v327_v35 }
  0x56   :  { %v335_v37 = vmul.f32 %v332_v10, %v574_v14 }
  0x58   :  { %338 = vst [vmem:[#allocation9 + $0xe] sm:$0x3] %v335_v37 }
  0x59   :  { %351 = dma.vmem_to_hbm [thread:$0]  %s344_s18, 256, %s346_s23, [#allocation4], %s505_s20, %s505_s20, %s506_s21  }
  0x5a   :  { %502 = dma.done.wait [#allocation4], 256  }
  0x5b   :  { %503 = vsyncadd [#allocation4], 4294967040 }
  0x5c   :  { %356 = vsyncpa [#allocation3], 1 }
  0x5d   :  { %357 = vsyncpa [#allocation4], 1 }
  0x5e   :  { %358 = vsyncpa [#allocation5], 1 }
  0x5f   :  { %359 = vsyncpa [#allocation6], 1 }

</bundles_post_ra>
